<compile_context>
chip_gen: v5e
topology: v5e:2x2
jax: 0.10.0
libtpu: 0.0.40
codegen_flags: <defaults>
</compile_context>

<pallas_src>
import functools

import jax
import jax.numpy as jnp
from jax.experimental import pallas as pl
from jax.experimental.pallas import tpu as pltpu


# ---------------------------------------------------------------------------
# Block-size selection: ~2 MiB per operand block, rows aligned to sublane pack.
# ---------------------------------------------------------------------------
_TARGET_BLOCK_BYTES = 2 * 1024 * 1024


def _pick_block_rows(M, F, itemsize, target_bytes=_TARGET_BLOCK_BYTES):
    row_align = max(8, 32 // itemsize)          # 8 for f32, 16 for bf16
    rows = (target_bytes // (F * itemsize)) // row_align * row_align
    rows = max(rows, row_align)
    # Either a multiple of row_align (partial last block handled by Pallas) or
    # the full row extent M (also legal for the (8,128) BlockSpec rule).
    return int(min(rows, M))


# ---------------------------------------------------------------------------
# Kernel 1: torch-style LayerNormalization over the last dim.
# ---------------------------------------------------------------------------
def _layernorm_kernel(x_ref, alpha_ref, bias_ref, o_ref, *, eps, features):
    # x_ref: (tm, F)  alpha_ref/bias_ref: (1, F)  o_ref: (tm, F)
    x = x_ref[...].astype(jnp.float32)
    # One-pass reduction: sum and sum-of-squares together (f32 accumulation).
    s1 = jnp.sum(x, axis=-1, keepdims=True)
    s2 = jnp.sum(x * x, axis=-1, keepdims=True)
    mean = s1 * jnp.float32(1.0 / features)
    # torch.std defaults to the unbiased estimator (divide by N-1).
    var = (s2 - s1 * mean) * jnp.float32(1.0 / (features - 1))
    var = jnp.maximum(var, 0.0)                 # guard tiny negative cancellation
    std = jnp.sqrt(var)
    inv = 1.0 / (std + jnp.float32(eps))        # per-row divide: tm ops, not tm*F
    alpha = alpha_ref[...].astype(jnp.float32)
    bias = bias_ref[...].astype(jnp.float32)
    y = alpha * ((x - mean) * inv) + bias
    o_ref[...] = y.astype(o_ref.dtype)


def _pallas_layernorm(x2d, alpha, bias, *, eps):
    """x2d: (M, F) -> torch-style LayerNorm over last dim, same shape/dtype."""
    M, F = x2d.shape
    itemsize = x2d.dtype.itemsize
    tm = _pick_block_rows(M, F, itemsize)
    grid = pl.cdiv(M, tm)                       # partial last block -> no pad

    kern = functools.partial(_layernorm_kernel, eps=eps, features=F)
    cost = pl.CostEstimate(
        flops=int(8 * M * F),
        transcendentals=int(M),
        bytes_accessed=int(2 * M * F * itemsize + 2 * F * 4),
    )

    return pl.pallas_call(
        kern,
        out_shape=jax.ShapeDtypeStruct((M, F), x2d.dtype),
        grid_spec=pltpu.PrefetchScalarGridSpec(
            num_scalar_prefetch=0,
            grid=(grid,),
            in_specs=[
                pl.BlockSpec((tm, F), lambda i: (i, 0)),   # x rows (lane-dense)
                pl.BlockSpec((1, F), lambda i: (0, 0)),    # alpha (resident)
                pl.BlockSpec((1, F), lambda i: (0, 0)),    # bias  (resident)
            ],
            out_specs=pl.BlockSpec((tm, F), lambda i: (i, 0)),
        ),
        compiler_params=pltpu.CompilerParams(
            dimension_semantics=("parallel",)),
        cost_estimate=cost,
    )(x2d, alpha.reshape(1, F), bias.reshape(1, F))


# ---------------------------------------------------------------------------
# Kernel 2: residual add (+ dropout in training mode), fused in one pass.
# ---------------------------------------------------------------------------
def _residual_add_kernel(x_ref, s_ref, o_ref):
    # Eval-mode dropout is the identity: out = x + sublayer_out.
    acc = x_ref[...].astype(jnp.float32) + s_ref[...].astype(jnp.float32)
    o_ref[...] = acc.astype(o_ref.dtype)


def _residual_dropout_kernel(seed_ref, x_ref, s_ref, o_ref, *, rate, features):
    # Training mode: drop each sublayer element with prob `rate`, scale survivors.
    # Stateless counter-based hash RNG (portable: pure jnp uint32 ops, no
    # Mosaic-only PRNG primitives) -> safe to mark the grid axis "parallel".
    tm = s_ref.shape[0]
    row0 = pl.program_id(0) * tm
    rows = jax.lax.broadcasted_iota(jnp.int32, s_ref.shape, 0) + row0
    cols = jax.lax.broadcasted_iota(jnp.int32, s_ref.shape, 1)
    idx = (rows * jnp.int32(features) + cols).astype(jnp.uint32)
    seed_u = seed_ref[0].astype(jnp.uint32)
    h = idx ^ (seed_u * jnp.uint32(0x9E3779B9))
    # murmur3-style 32-bit finalizer (avalanche).
    h = h ^ (h >> 16)
    h = h * jnp.uint32(0x7FEB352D)
    h = h ^ (h >> 15)
    h = h * jnp.uint32(0x846CA68B)
    h = h ^ (h >> 16)

    threshold = jnp.uint32(min(int(round(rate * 4294967296.0)), 4294967295))
    keep = h >= threshold                       # P(keep) = 1 - rate
    scale = jnp.float32(1.0 / (1.0 - rate))
    s = s_ref[...].astype(jnp.float32)
    # No zeros_like temporary: scalar-branch where, then one multiply.
    dropped = s * jnp.where(keep, scale, jnp.float32(0.0))
    o_ref[...] = (x_ref[...].astype(jnp.float32) + dropped).astype(o_ref.dtype)


def _pallas_residual_dropout(x2d, s2d, *, rate, seed, deterministic):
    """out = x2d + dropout(s2d); shapes (M, F)."""
    M, F = x2d.shape
    itemsize = x2d.dtype.itemsize
    tm = _pick_block_rows(M, F, itemsize)       # 3 operands x 2 bufs ~ 12 MiB max
    grid = pl.cdiv(M, tm)
    cost = pl.CostEstimate(
        flops=int(2 * M * F),
        transcendentals=0,
        bytes_accessed=int(3 * M * F * itemsize),
    )
    # NOTE: could alias s2d -> output (input_output_aliases) to drop one HBM
    # buffer; skipped here to keep s available for a backward pass.

    if deterministic or rate == 0.0:
        return pl.pallas_call(
            _residual_add_kernel,
            out_shape=jax.ShapeDtypeStruct((M, F), x2d.dtype),
            grid_spec=pltpu.PrefetchScalarGridSpec(
                num_scalar_prefetch=0,
                grid=(grid,),
                in_specs=[
                    pl.BlockSpec((tm, F), lambda i: (i, 0)),
                    pl.BlockSpec((tm, F), lambda i: (i, 0)),
                ],
                out_specs=pl.BlockSpec((tm, F), lambda i: (i, 0)),
            ),
            compiler_params=pltpu.CompilerParams(
                dimension_semantics=("parallel",)),
            cost_estimate=cost,
        )(x2d, s2d)

    kern = functools.partial(_residual_dropout_kernel, rate=rate, features=F)
    seed_arr = jnp.asarray([seed], dtype=jnp.int32)
    return pl.pallas_call(
        kern,
        out_shape=jax.ShapeDtypeStruct((M, F), x2d.dtype),
        grid_spec=pltpu.PrefetchScalarGridSpec(
            num_scalar_prefetch=1,                 # seed lands in SMEM
            grid=(grid,),
            in_specs=[
                pl.BlockSpec((tm, F), lambda i, seed: (i, 0)),
                pl.BlockSpec((tm, F), lambda i, seed: (i, 0)),
            ],
            out_specs=pl.BlockSpec((tm, F), lambda i, seed: (i, 0)),
        ),
        compiler_params=pltpu.CompilerParams(
            dimension_semantics=("parallel",)),     # hash RNG is order-independent
        cost_estimate=cost,
    )(seed_arr, x2d, s2d)


# ---------------------------------------------------------------------------
# Module wrapper: ResidualConnection
# ---------------------------------------------------------------------------
class ResidualConnectionPallas:
    """JAX/Pallas equivalent of the PyTorch ResidualConnection module."""

    def __init__(self, features: int, dropout: float, eps: float = 1e-6):
        assert 0.0 <= dropout < 1.0
        assert features >= 2, "unbiased std divides by (features - 1)"
        self.features = features
        self.rate = float(dropout)
        self.eps = float(eps)
        # LayerNormalization parameters (same init as the PyTorch module).
        self.alpha = jnp.ones((features,), jnp.float32)
        self.ln_bias = jnp.zeros((features,), jnp.float32)

    def __call__(self, x, sublayer, *, deterministic=True, rng_seed=0):
        # NOTE: callers should vary `rng_seed` per layer / training step;
        # a repeated seed reproduces the same dropout mask.
        orig_shape = x.shape
        F = orig_shape[-1]
        assert F == self.features
        x2d = x.reshape(-1, F)                     # free reshape (contiguous)

        normed2d = _pallas_layernorm(
            x2d, self.alpha, self.ln_bias, eps=self.eps)

        # TODO(synk): `sublayer` is an arbitrary user callable; it runs as plain
        # JAX between the two Pallas kernels and cannot be fused into a fixed kernel.
        s = sublayer(normed2d.reshape(orig_shape))
        s2d = s.reshape(-1, F)

        out2d = _pallas_residual_dropout(
            x2d, s2d, rate=self.rate, seed=rng_seed,
            deterministic=deterministic)
        return out2d.reshape(orig_shape)


# ---------------------------------------------------------------------------
# Demo / correctness check
# ---------------------------------------------------------------------------
if __name__ == "__main__":
    key = jax.random.PRNGKey(0)
    k_x, k_w, k_b = jax.random.split(key, 3)

    # Small shapes implied by the module: (batch, seq, features).
    B, S, F = 2, 8, 512
    x = jax.random.normal(k_x, (B, S, F), jnp.float32)

    # A simple feed-forward sublayer (plain JAX), as used in a transformer block.
    w = jax.random.normal(k_w, (F, F), jnp.float32) * 0.02
    b = jax.random.normal(k_b, (F,), jnp.float32) * 0.02

    def sublayer(h):
        return jax.nn.gelu(h @ w + b)

    module = ResidualConnectionPallas(features=F, dropout=0.1)

    # Eval-mode forward (dropout = identity) — compare against a pure-JAX reference.
    out = module(x, sublayer, deterministic=True)
    out = jax.block_until_ready(out)

    mean = jnp.mean(x, axis=-1, keepdims=True)
    std = jnp.std(x, axis=-1, keepdims=True, ddof=1)      # torch unbiased std
    normed_ref = module.alpha * (x - mean) / (std + module.eps) + module.ln_bias
    ref = x + sublayer(normed_ref)

    assert out.shape == x.shape
    assert jnp.allclose(out, ref, atol=1e-3, rtol=1e-3), \
        float(jnp.max(jnp.abs(out - ref)))

    # Training-mode forward (stochastic dropout via stateless in-kernel hash RNG):
    # verify it runs, is finite, has the right shape, and actually drops something.
    out_train = module(x, sublayer, deterministic=False, rng_seed=1234)
    out_train = jax.block_until_ready(out_train)
    assert out_train.shape == x.shape
    assert bool(jnp.all(jnp.isfinite(out_train)))
    assert bool(jnp.any(jnp.abs(out_train - out) > 1e-6))   # mask not identity

    print("KERNEL_OK")
</pallas_src>

<mosaic_0001>
module attributes {stable_mosaic.version = 11 : i64} {
  func.func @_layernorm_kernel(%arg0: i32, %arg1: memref<16x512xf32, #tpu.memory_space<vmem>>, %arg2: memref<1x512xf32, #tpu.memory_space<vmem>>, %arg3: memref<1x512xf32, #tpu.memory_space<vmem>>, %arg4: memref<16x512xf32, #tpu.memory_space<vmem>>) attributes {dimension_semantics = [#tpu.dimension_semantics<parallel>], iteration_bounds = array<i64: 1>, scalar_prefetch = 0 : i64, scratch_operands = 0 : i64, tpu.core_type = #tpu.core_type<tc>, window_params = [{transform_indices = @transform_0, window_bounds = array<i64: 16, 512>}, {pipeline_mode = #tpu.pipeline_mode<synchronous>, transform_indices = @transform_1, window_bounds = array<i64: 1, 512>}, {pipeline_mode = #tpu.pipeline_mode<synchronous>, transform_indices = @transform_2, window_bounds = array<i64: 1, 512>}, {transform_indices = @transform_3, window_bounds = array<i64: 16, 512>}]} {
    %c0 = arith.constant 0 : index
    %c0_0 = arith.constant 0 : index
    %0 = vector.load %arg1[%c0, %c0_0] : memref<16x512xf32, #tpu.memory_space<vmem>>, vector<16x512xf32>
    %cst = arith.constant dense<0.000000e+00> : vector<16xf32>
    %1 = vector.multi_reduction <add>, %0, %cst [1] : vector<16x512xf32> to vector<16xf32>
    %2 = vector.shape_cast %1 : vector<16xf32> to vector<16x1xf32>
    %3 = arith.mulf %0, %0 : vector<16x512xf32>
    %cst_1 = arith.constant dense<0.000000e+00> : vector<16xf32>
    %4 = vector.multi_reduction <add>, %3, %cst_1 [1] : vector<16x512xf32> to vector<16xf32>
    %5 = vector.shape_cast %4 : vector<16xf32> to vector<16x1xf32>
    %cst_2 = arith.constant 0.001953125 : f32
    %6 = vector.broadcast %cst_2 : f32 to vector<16x1xf32>
    %7 = arith.mulf %2, %6 : vector<16x1xf32>
    %8 = arith.mulf %2, %7 : vector<16x1xf32>
    %9 = arith.subf %5, %8 : vector<16x1xf32>
    %cst_3 = arith.constant 0.00195694715 : f32
    %10 = vector.broadcast %cst_3 : f32 to vector<16x1xf32>
    %11 = arith.mulf %9, %10 : vector<16x1xf32>
    %cst_4 = arith.constant 0.000000e+00 : f32
    %12 = vector.broadcast %cst_4 : f32 to vector<16x1xf32>
    %13 = arith.maximumf %11, %12 : vector<16x1xf32>
    %14 = math.sqrt %13 : vector<16x1xf32>
    %cst_5 = arith.constant 9.99999997E-7 : f32
    %15 = vector.broadcast %cst_5 : f32 to vector<16x1xf32>
    %16 = arith.addf %14, %15 : vector<16x1xf32>
    %cst_6 = arith.constant 1.000000e+00 : f32
    %17 = vector.broadcast %cst_6 : f32 to vector<16x1xf32>
    %18 = arith.divf %17, %16 : vector<16x1xf32>
    %c0_7 = arith.constant 0 : index
    %c0_8 = arith.constant 0 : index
    %19 = vector.load %arg2[%c0_7, %c0_8] : memref<1x512xf32, #tpu.memory_space<vmem>>, vector<1x512xf32>
    %c0_9 = arith.constant 0 : index
    %c0_10 = arith.constant 0 : index
    %20 = vector.load %arg3[%c0_9, %c0_10] : memref<1x512xf32, #tpu.memory_space<vmem>>, vector<1x512xf32>
    %21 = vector.broadcast %7 : vector<16x1xf32> to vector<16x512xf32>
    %22 = arith.subf %0, %21 : vector<16x512xf32>
    %23 = vector.broadcast %18 : vector<16x1xf32> to vector<16x512xf32>
    %24 = arith.mulf %22, %23 : vector<16x512xf32>
    %25 = vector.broadcast %19 : vector<1x512xf32> to vector<16x512xf32>
    %26 = arith.mulf %25, %24 : vector<16x512xf32>
    %27 = vector.broadcast %20 : vector<1x512xf32> to vector<16x512xf32>
    %28 = arith.addf %26, %27 : vector<16x512xf32>
    %c0_11 = arith.constant 0 : index
    %c0_12 = arith.constant 0 : index
    %29 = vector.load %arg4[%c0_11, %c0_12] : memref<16x512xf32, #tpu.memory_space<vmem>>, vector<16x512xf32>
    tpu.vector_store %arg4[%c0_11, %c0_12], %28 {strides = array<i32>} : memref<16x512xf32, #tpu.memory_space<vmem>>, vector<16x512xf32>,
    return
  }
  func.func @transform_0(%arg0: i32) -> (i32, i32) {
    %c0_i32 = arith.constant 0 : i32
    %c0_i32_0 = arith.constant 0 : i32
    return %arg0, %c0_i32 : i32, i32
  }
  func.func @transform_1(%arg0: i32) -> (i32, i32) {
    %c0_i32 = arith.constant 0 : i32
    %c0_i32_0 = arith.constant 0 : i32
    %c0_i32_1 = arith.constant 0 : i32
    return %c0_i32, %c0_i32_0 : i32, i32
  }
  func.func @transform_2(%arg0: i32) -> (i32, i32) {
    %c0_i32 = arith.constant 0 : i32
    %c0_i32_0 = arith.constant 0 : i32
    %c0_i32_1 = arith.constant 0 : i32
    return %c0_i32, %c0_i32_0 : i32, i32
  }
  func.func @transform_3(%arg0: i32) -> (i32, i32) {
    %c0_i32 = arith.constant 0 : i32
    %c0_i32_0 = arith.constant 0 : i32
    return %arg0, %c0_i32 : i32, i32
  }
}

</mosaic_0001>

<bundles_post_ra>
// kernel: tpu_custom_call.1
= control target key start
LH: loop header
LB: loop body
LE: loop exit
PB: predicated region body
PF: predicated region fallthrough
CT: control target
= control target key end

     0   :  { %8 = vsyncpa [#allocation3], 0  ;;  %s474_s0 = inlined_call_operand.hbm [shape: f32[16,512], index: 0, kind: input, shape index: {}]   ;;  %s475_s1 = inlined_call_operand.hbm [shape: f32[1,512], index: 1, kind: input, shape index: {}]   ;;  %s476_s2 = inlined_call_operand.hbm [shape: f32[1,512], index: 2, kind: input, shape index: {}]   ;;  %s477_s3 = inlined_call_operand.hbm [shape: f32[16,512], index: 3, kind: output, shape index: {}]  }
   0x1   :  { %9 = vsyncpa [#allocation6], 0  ;;  %s29_s14 = sshll.u32 %s475_s1, 4  ;;  %s30_s14 = int_to_ptr.hbm [resolvable:$true] %s29_s14 }
   0x2   :  { %10 = vsyncpa [#allocation4], 0  ;;  %s356_s15 = smov [#allocation5]   ;;  %s15_s19 = sshll.u32 %s474_s0, 4  ;;  %s16_s19 = int_to_ptr.hbm [resolvable:$true] %s15_s19 }
   0x3   :  { %s31_s16 = sshll.u32 %s356_s15, 4  ;;  %s357_s20 = smov [#allocation2]   ;;  %s32_s16 = int_to_ptr.vmem [resolvable:$true] %s31_s16 }
   0x4   :  { %34 = dma.hbm_to_vmem [thread:$0]  %s30_s14, 64, %s32_s16, [#allocation6]  }
   0x5   :  { %s17_s21 = sshll.u32 %s357_s20, 4  ;;  %s358_s22 = smov 512   ;;  %s18_s21 = int_to_ptr.vmem [resolvable:$true] %s17_s21 }
   0x6   :  { %s359_s23 = smov 32   ;;  %s40_s25 = sshll.u32 %s476_s2, 4  ;;  %s41_s25 = int_to_ptr.hbm [resolvable:$true] %s40_s25 }
   0x7   :  { %23 = dma.hbm_to_vmem [thread:$0]  %s16_s19, 1024, %s18_s21, [#allocation3], %s358_s22, %s358_s22, %s359_s23  }
   0x8   :  { %s360_s26 = smov [#allocation7]  }
   0x9   :  { %s42_s27 = sshll.u32 %s360_s26, 4  ;;  %s43_s27 = int_to_ptr.vmem [resolvable:$true] %s42_s27 }
   0xa   :  { %45 = dma.hbm_to_vmem [thread:$0]  %s41_s25, 64, %s43_s27, [#allocation6]  }
   0xb   :  { %350 = dma.done.wait [#allocation3], 1024  }
   0xc   :  { %351 = vsyncadd [#allocation3], 4294966272 }
   0xd   :  { %352 = dma.done.wait [#allocation6], 128  }
   0xe   :  { %353 = vsyncadd [#allocation6], 4294967168  ;;  %v394_v0 = vld [vmem:[#allocation2] sm:$0xff]  ;;  %v396_v1 = vld [vmem:[#allocation2 + $0x8] sm:$0xff]  ;;  %s361_s0 = smov [#allocation8]   ;;  %s226_s30 = sshll.u32 %s477_s3, 4  ;;  %s227_s30 = int_to_ptr.hbm [resolvable:$true] %s226_s30 }
   0xf   :  { %v398_v2 = vld [vmem:[#allocation2 + $0x10] sm:$0xff]  ;;  %v66_v3 = vadd.f32 %v396_v1, %v394_v0  ;;  %v76_v4 = vmul.f32 %v394_v0, %v394_v0  ;;  %v77_v5 = vmul.f32 %v396_v1, %v396_v1  ;;  %v408_v7 = vld [vmem:[#allocation2 + $0x20] sm:$0xff]  ;;  %v410_v8 = vld [vmem:[#allocation2 + $0x28] sm:$0xff]  ;;  %s224_s2 = sshll.u32 %s361_s0, 4  ;;  %s225_s2 = int_to_ptr.vmem [resolvable:$true] %s224_s2 }
  0x10   :  { %v78_v6 = vmul.f32 %v398_v2, %v398_v2  ;;  %v412_v9 = vld [vmem:[#allocation2 + $0x18] sm:$0xff]  ;;  %v80_v10 = vmul.f32 %v408_v7, %v408_v7  ;;  %v81_v11 = vmul.f32 %v410_v8, %v410_v8  ;;  %v71_v15 = vadd.f32 %v410_v8, %v408_v7  ;;  %v423_v16 = vld [vmem:[#allocation2 + $0x30] sm:$0xff] }
  0x11   :  { %v67_v12 = vadd.f32 %v66_v3, %v398_v2  ;;  %v79_v13 = vmul.f32 %v412_v9, %v412_v9  ;;  %v84_v14 = vadd.f32 %v77_v5, %v76_v4  ;;  %v82_v19 = vmul.f32 %v423_v16, %v423_v16  ;;  %v429_v23 = vld [vmem:[#allocation2 + $0x38] sm:$0xff] }
  0x12   :  { %v89_v20 = vadd.f32 %v81_v11, %v80_v10  ;;  %v72_v22 = vadd.f32 %v71_v15, %v423_v16  ;;  %v83_v24 = vmul.f32 %v429_v23, %v429_v23  ;;  %v446_v15 = vld [vmem:[#allocation7] sm:$0xf] }
  0x13   :  { %v68_v17 = vadd.f32 %v67_v12, %v412_v9  ;;  %v85_v18 = vadd.f32 %v84_v14, %v78_v6  ;;  %v440_v12 = vld [vmem:[#allocation5] sm:$0xf] }
  0x14   :  { %v90_v25 = vadd.f32 %v89_v20, %v82_v19  ;;  %v73_v26 = vadd.f32 %v72_v22, %v429_v23  ;;  %v180_v22 = vperm.slane %v440_v12, 1 }
  0x15   :  { %69 = vadd.xlane.f32.xlu0 %v68_v17  ;;  %v86_v21 = vadd.f32 %v85_v18, %v79_v13 }
  0x16   :  { %v91_v27 = vadd.f32 %v90_v25, %v83_v24  ;;  %v182_v25 = vperm.slane %v440_v12, 3 }
  0x17   :  { %87 = vadd.xlane.f32.xlu1 %v86_v21  ;;  %v179_v21 = vperm.slane %v440_v12, 0 }
  0x1d   :  { %74 = vadd.xlane.f32.xlu0 %v73_v26 }
  0x1f   :  { %92 = vadd.xlane.f32.xlu1 %v91_v27 }
  0x88   :  { %v70_v28 = vpop.xlane.xlu0 %69 }
  0x89   :  { %v434_v29 = vmul.f32 0.001953125, %v70_v28 }
  0x8a   :  { %v88_v30 = vpop.xlane.xlu1 %87 }
  0x8b   :  { %v96_v31 = vmul.f32 %v434_v29, %v70_v28  ;;  %v162_v13 = vsub.f32 %v394_v0, %v434_v29  ;;  %v163_v14 = vsub.f32 %v396_v1, %v434_v29  ;;  %v164_v17 = vsub.f32 %v398_v2, %v434_v29 }
  0x8c   :  { %v165_v18 = vsub.f32 %v412_v9, %v434_v29  ;;  %v181_v0 = vperm.slane %v440_v12, 2  ;;  %v196_v2 = vperm.slane %v446_v15, 0  ;;  %v197_v9 = vperm.slane %v446_v15, 1 }
  0x8d   :  { %v98_v32 = vsub.f32 %v88_v30, %v96_v31  ;;  %v198_v28 = vperm.slane %v446_v15, 2 }
  0x8f   :  { %v100_v33 = vmul.f32 0.0019569471, %v98_v32 }
  0x90   :  { %v75_v34 = vpop.xlane.xlu0 %74 }
  0x91   :  { %v102_v35 = vmax.f32 %v100_v33, 0.0  ;;  %v437_v36 = vmul.f32 0.001953125, %v75_v34 }
  0x92   :  { %v93_v37 = vpop.xlane.xlu1 %92 }
  0x93   :  { %246 = vrsqrt.f32 %v102_v35  ;;  %v97_v38 = vmul.f32 %v437_v36, %v75_v34  ;;  %vm111_vm0 = vcmp.eq.f32.partialorder %v102_v35, inf  ;;  %v114_v51 = vand.u32 2147483648, %v102_v35 }
  0x94   :  { %vm113_vm1 = vcmp.eq.f32.partialorder %v102_v35, 0.0 }
  0x95   :  { %v99_v39 = vsub.f32 %v93_v37, %v97_v38 }
  0x97   :  { %v101_v40 = vmul.f32 0.0019569471, %v99_v39 }
  0x99   :  { %v247_v41 = vpop.eup %246  ;;  %v103_v43 = vmax.f32 %v101_v40, 0.0 }
  0x9a   :  { %v105_v42 = vmul.f32 %v247_v41, %v102_v35 }
  0x9b   :  { %248 = vrsqrt.f32 %v103_v43  ;;  %vm123_vm2 = vcmp.eq.f32.partialorder %v103_v43, inf  ;;  %v126_v60 = vand.u32 2147483648, %v103_v43  ;;  %vm125_vm3 = vcmp.eq.f32.partialorder %v103_v43, 0.0 }
  0x9c   :  { %v106_v44 = vmul.f32 %v247_v41, %v105_v42 }
  0x9e   :  { %v107_v45 = vmul.f32 0.5, %v106_v44 }
  0xa0   :  { %v108_v46 = vsub.f32 1.5, %v107_v45 }
  0xa1   :  { %v249_v47 = vpop.eup %248 }
  0xa2   :  { %v109_v48 = vmul.f32 %v247_v41, %v108_v46  ;;  %v117_v49 = vmul.f32 %v249_v47, %v103_v43 }
  0xa4   :  { %v110_v50 = vmul.f32 %v109_v48, %v102_v35  ;;  %v118_v52 = vmul.f32 %v249_v47, %v117_v49  ;;  %v166_v48 = vsub.f32 %v408_v7, %v437_v36  ;;  %v167_v49 = vsub.f32 %v410_v8, %v437_v36 }
  0xa6   :  { %v112_v53 = vsel %vm111_vm0, %v102_v35, %v110_v50  ;;  %v119_v55 = vmul.f32 0.5, %v118_v52  ;;  %v199_v35 = vperm.slane %v446_v15, 3  ;;  %v169_v52 = vsub.f32 %v429_v23, %v437_v36 }
  0xa7   :  { %v115_v54 = vsel %vm113_vm1, %v114_v51, %v112_v53  ;;  %v168_v51 = vsub.f32 %v423_v16, %v437_v36 }
  0xa8   :  { %v128_v56 = vadd.f32 1e-06, %v115_v54  ;;  %v120_v57 = vsub.f32 1.5, %v119_v55 }
  0xaa   :  { %250 = vrcp.f32 %v128_v56  ;;  %v121_v58 = vmul.f32 %v249_v47, %v120_v57  ;;  %v141_v6 = vand.u32 2147483648, %v128_v56  ;;  %v139_v11 = vand.u32 2147483647, %v128_v56 }
  0xab   :  { %vm135_vm5 = vweird.f32 %v128_v56 }
  0xac   :  { %v122_v59 = vmul.f32 %v121_v58, %v103_v43  ;;  %v142_v20 = vor.u32 1.1754944e-38, %v141_v6  ;;  %vm140_vm7 = vcmp.eq.f32.partialorder %v139_v11, 8.507059e+37 }
  0xae   :  { %v124_v61 = vsel %vm123_vm2, %v103_v43, %v122_v59 }
  0xaf   :  { %v127_v63 = vsel %vm125_vm3, %v126_v60, %v124_v61 }
  0xb0   :  { %v251_v62 = vpop.eup %250  ;;  %v129_v4 = vadd.f32 1e-06, %v127_v63 }
  0xb1   :  { %v131_v3 = vmul.f32 %v251_v62, %v128_v56  ;;  %vm136_vm4 = vweird.f32 %v251_v62 }
  0xb2   :  { %252 = vrcp.f32 %v129_v4  ;;  %vm137_vm6 = vmor %vm135_vm5, %vm136_vm4  ;;  %v156_v34 = vand.u32 2147483648, %v129_v4  ;;  %v154_v42 = vand.u32 2147483647, %v129_v4  ;;  %vm150_vm9 = vweird.f32 %v129_v4 }
  0xb3   :  { %v132_v5 = vsub.f32 1.0, %v131_v3 }
  0xb4   :  { %v157_v50 = vor.u32 1.1754944e-38, %v156_v34  ;;  %vm155_vm11 = vcmp.eq.f32.partialorder %v154_v42, 8.507059e+37 }
  0xb5   :  { %v133_v10 = vmul.f32 %v251_v62, %v132_v5 }
  0xb7   :  { %v134_v19 = vadd.f32 %v251_v62, %v133_v10 }
  0xb8   :  { %v253_v24 = vpop.eup %252 }
  0xb9   :  { %v138_v1 = vsel %vm137_vm6, %v251_v62, %v134_v19  ;;  %v146_v26 = vmul.f32 %v253_v24, %v129_v4  ;;  %vm151_vm8 = vweird.f32 %v253_v24 }
  0xba   :  { %v143_v27 = vsel %vm140_vm7, %v142_v20, %v138_v1  ;;  %vm152_vm10 = vmor %vm150_vm9, %vm151_vm8 }
  0xbb   :  { %v170_v29 = vmul.f32 %v162_v13, %v143_v27  ;;  %v171_v30 = vmul.f32 %v163_v14, %v143_v27  ;;  %v172_v31 = vmul.f32 %v164_v17, %v143_v27  ;;  %v173_v32 = vmul.f32 %v165_v18, %v143_v27 }
  0xbc   :  { %v147_v33 = vsub.f32 1.0, %v146_v26 }
  0xbd   :  { %v187_v37 = vmul.f32 %v179_v21, %v170_v29  ;;  %v188_v38 = vmul.f32 %v180_v22, %v171_v30  ;;  %v189_v39 = vmul.f32 %v181_v0, %v172_v31  ;;  %v190_v40 = vmul.f32 %v182_v25, %v173_v32 }
  0xbe   :  { %v148_v41 = vmul.f32 %v253_v24, %v147_v33 }
  0xbf   :  { %v204_v43 = vadd.f32 %v196_v2, %v187_v37  ;;  %v205_v44 = vadd.f32 %v197_v9, %v188_v38  ;;  %v206_v45 = vadd.f32 %v198_v28, %v189_v39  ;;  %v207_v47 = vadd.f32 %v199_v35, %v190_v40 }
  0xc0   :  { %v149_v46 = vadd.f32 %v253_v24, %v148_v41 }
  0xc1   :  { %212 = vst [vmem:[#allocation8] sm:$0xff] %v204_v43 }
  0xc2   :  { %v153_v53 = vsel %vm152_vm10, %v253_v24, %v149_v46  ;;  %213 = vst [vmem:[#allocation8 + $0x8] sm:$0xff] %v205_v44 }
  0xc3   :  { %v158_v54 = vsel %vm155_vm11, %v157_v50, %v153_v53  ;;  %214 = vst [vmem:[#allocation8 + $0x10] sm:$0xff] %v206_v45 }
  0xc4   :  { %v174_v55 = vmul.f32 %v166_v48, %v158_v54  ;;  %v175_v56 = vmul.f32 %v167_v49, %v158_v54  ;;  %v176_v7 = vmul.f32 %v168_v51, %v158_v54  ;;  %v177_v57 = vmul.f32 %v169_v52, %v158_v54  ;;  %215 = vst [vmem:[#allocation8 + $0x18] sm:$0xff] %v207_v47 }
  0xc6   :  { %v191_v8 = vmul.f32 %v179_v21, %v174_v55  ;;  %v192_v58 = vmul.f32 %v180_v22, %v175_v56  ;;  %v193_v59 = vmul.f32 %v181_v0, %v176_v7  ;;  %v194_v60 = vmul.f32 %v182_v25, %v177_v57 }
  0xc8   :  { %v208_v61 = vadd.f32 %v196_v2, %v191_v8  ;;  %v209_v62 = vadd.f32 %v197_v9, %v192_v58  ;;  %v210_v16 = vadd.f32 %v198_v28, %v193_v59  ;;  %v211_v23 = vadd.f32 %v199_v35, %v194_v60 }
  0xca   :  { %216 = vst [vmem:[#allocation8 + $0x20] sm:$0xff] %v208_v61 }
  0xcb   :  { %217 = vst [vmem:[#allocation8 + $0x28] sm:$0xff] %v209_v62 }
  0xcc   :  { %218 = vst [vmem:[#allocation8 + $0x30] sm:$0xff] %v210_v16 }
  0xcd   :  { %219 = vst [vmem:[#allocation8 + $0x38] sm:$0xff] %v211_v23 }
  0xce   :  { %232 = dma.vmem_to_hbm [thread:$0]  %s225_s2, 1024, %s227_s30, [#allocation4], %s358_s22, %s358_s22, %s359_s23  }
  0xcf   :  { %354 = dma.done.wait [#allocation4], 1024  }
  0xd0   :  { %355 = vsyncadd [#allocation4], 4294966272 }
  0xd1   :  { %237 = vsyncpa [#allocation3], 1 }
  0xd2   :  { %238 = vsyncpa [#allocation6], 1 }
  0xd3   :  { %239 = vsyncpa [#allocation4], 1 }

</bundles_post_ra>
